<compile_context>
chip_gen: v5e
topology: v5e:2x2
jax: 0.10.0
libtpu: 0.0.40
codegen_flags: <defaults>
</compile_context>

<pallas_src>
import functools

import jax
import jax.numpy as jnp
from jax import lax
from jax.experimental import pallas as pl
from jax.experimental.pallas import tpu as pltpu
import numpy as np


LANE = 128
SUBLANE = 8
# > 32 MiB default scoped limit (v6e/v7x) and > 16 MiB (v5e); < 64 MiB physical
# per-TC on v7x, leaving headroom for compiler-internal scratch.
VMEM_LIMIT_BYTES = 48 * 1024 * 1024


def _round_up(x, m):
    return (x + m - 1) // m * m


# --------------------------------------------------------------------------
# Kernel 1: batched input projection  I = X @ W_ih_fused + b  (fully parallel)
# --------------------------------------------------------------------------
def input_proj_kernel(x_ref, w_ref, b_ref, o_ref):
    # x_ref: (TM, Hp) bf16, w_ref: (Hp, 3Hp) bf16, b_ref: (1, 3Hp) f32,
    # o_ref: (TM, 3Hp) bf16.  bf16 MXU operands, f32 accumulation.
    acc = jnp.dot(x_ref[...], w_ref[...], preferred_element_type=jnp.float32)
    o_ref[...] = (acc + b_ref[...]).astype(o_ref.dtype)


# --------------------------------------------------------------------------
# Kernel 2: serial GRU recurrence over time blocks (optionally batch-split)
# --------------------------------------------------------------------------
def gru_recurrence_kernel(len_ref, i_ref, h0_ref, whh_ref, bhn_ref,
                          out_ref, hfin_ref, h_scratch, *, unroll):
    """grid = (NB, NT): axis 0 = batch split ("parallel", megacore on v7x),
    axis 1 = time blocks ("arbitrary", true recurrence).

    len_ref : (Bb, 1)        int32  sequence lengths (batch slice)
    i_ref   : (TT, Bb, 3Hp)  bf16   precomputed x@W_ih + folded biases [r,z,n]
    h0_ref  : (Bb, Hp)       f32    initial hidden (batch slice)
    whh_ref : (Hp, 3Hp)      bf16   fused hidden->hidden weights [r,z,n]
    bhn_ref : (1, Hp)        f32    b_hh of the n gate (scaled by r per step)
    out_ref : (TT, Bb, Hp)   f32    outputs (zero where t >= len)
    hfin_ref: (Bb, Hp)       f32    final hidden (written on last time block)
    h_scratch: VMEM (Bb, Hp) f32    hidden-state carry across time blocks
    """
    tb = pl.program_id(1)
    num_tb = pl.num_programs(1)
    TT = i_ref.shape[0]
    Bb, Hp = h0_ref.shape

    @pl.when(tb == 0)
    def _():
        h_scratch[...] = h0_ref[...].astype(jnp.float32)

    # Loop invariants hoisted out of the (partially unrolled) serial loop.
    lens = len_ref[...]                                   # (Bb, 1) int32
    w_hh = whh_ref[...]                                   # (Hp, 3Hp) bf16
    b_hn = jnp.broadcast_to(bhn_ref[...], (Bb, Hp))       # hoisted (no in-loop CSE)
    t0 = tb * TT

    def step(s, h_prev):
        t = t0 + s
        i_t = i_ref[s]                                    # (Bb, 3Hp) bf16
        # Single fused MXU issue per step; bf16 operands, f32 accumulation.
        hh = jnp.dot(h_prev.astype(jnp.bfloat16), w_hh,
                     preferred_element_type=jnp.float32)  # (Bb, 3Hp) f32
        # Hp is a multiple of 128 -> lane-aligned gate slices (free selects).
        r = jax.nn.sigmoid(i_t[:, 0:Hp] + hh[:, 0:Hp])
        z = jax.nn.sigmoid(i_t[:, Hp:2 * Hp] + hh[:, Hp:2 * Hp])
        n = jnp.tanh(i_t[:, 2 * Hp:3 * Hp] + r * (hh[:, 2 * Hp:3 * Hp] + b_hn))
        h_new = (1.0 - z) * n + z * h_prev

        # packed-sequence masking: freeze h and zero outputs past each length.
        valid = lens > t                                  # (Bb, 1) bool
        out_ref[s] = jnp.where(valid, h_new, 0.0).astype(out_ref.dtype)
        return jnp.where(valid, h_new, h_prev)

    h_last = lax.fori_loop(0, TT, step, h_scratch[...], unroll=unroll)
    h_scratch[...] = h_last

    @pl.when(tb == num_tb - 1)
    def _():
        hfin_ref[...] = h_last.astype(hfin_ref.dtype)


# --------------------------------------------------------------------------
# Wrapper (EncoderRNN.forward equivalent)
# --------------------------------------------------------------------------
def encoder_rnn_forward(tokens, hidden, input_len, params, *,
                        time_block=16, unroll=4):
    emb, w_ih, w_hh, b_ih, b_hh = (params["emb"], params["w_ih"], params["w_hh"],
                                   params["b_ih"], params["b_hh"])
    T, B = tokens.shape
    H = emb.shape[1]

    # ---- pad hidden dim to lane width, batch to sublane width ----
    Hp = _round_up(H, LANE)
    G3 = 3 * Hp
    Bp = _round_up(B, SUBLANE)

    # ---- parameter prep: fuse gates [r, z, n] (x @ W layout), zero-pad to Hp ----
    def pad_gate_w(w):  # (3, H, H) -> (Hp, 3Hp)
        wp = jnp.pad(w, ((0, 0), (0, Hp - H), (0, Hp - H)))
        return jnp.concatenate([wp[0], wp[1], wp[2]], axis=1)

    def pad_gate_b(parts):  # list of (1, H) -> (1, 3Hp)
        return jnp.concatenate(
            [jnp.pad(p, ((0, 0), (0, Hp - H))) for p in parts], axis=1)

    w_ih_f = pad_gate_w(w_ih).astype(jnp.bfloat16)           # (Hp, 3Hp) bf16
    w_hh_f = pad_gate_w(w_hh).astype(jnp.bfloat16)           # (Hp, 3Hp) bf16
    # Fold b_ih (all gates) + b_hh (r, z) into the input projection; b_hh[n]
    # stays in the recurrence (it is multiplied by r).
    b_proj = pad_gate_b([b_ih[0] + b_hh[0], b_ih[1] + b_hh[1], b_ih[2]]
                        ).astype(jnp.float32)                # (1, 3Hp) f32
    b_hn = jnp.pad(b_hh[2], ((0, 0), (0, Hp - H))).astype(jnp.float32)  # (1, Hp)

    # ---- time blocking for the recurrent kernel ----
    TT = min(T, time_block)
    NT = -(-T // TT)
    T_pad = NT * TT

    # ---- batch split across TensorCores (v7x megacore); no-op elsewhere ----
    try:
        num_tc = int(getattr(jax.devices()[0], "num_cores", 1) or 1)
    except Exception:
        num_tc = 1
    NB = 2 if (num_tc >= 2 and Bp % (2 * SUBLANE) == 0) else 1
    Bb = Bp // NB

    # ---- embedding lookup (JAX glue: gather), pad to (T_pad, Bp, Hp), bf16 ----
    embedded = jnp.take(emb, tokens, axis=0).astype(jnp.bfloat16)   # (T, B, H)
    embedded = jnp.pad(embedded, ((0, T_pad - T), (0, Bp - B), (0, Hp - H)))

    # ---- Pallas kernel 1: input projections for all steps, one big matmul ----
    rows = T_pad * Bp
    if rows >= 2048:
        TM = 1024
    elif rows >= 512:
        TM = 512
    else:
        TM = rows                                   # Bp is a multiple of 8
    rows_pad = _round_up(rows, TM)
    x_flat = embedded.reshape(rows, Hp)
    if rows_pad > rows:
        x_flat = jnp.pad(x_flat, ((0, rows_pad - rows), (0, 0)))

    i_flat = pl.pallas_call(
        input_proj_kernel,
        out_shape=jax.ShapeDtypeStruct((rows_pad, G3), jnp.bfloat16),
        grid_spec=pltpu.PrefetchScalarGridSpec(
            num_scalar_prefetch=0,
            grid=(rows_pad // TM,),
            in_specs=[
                pl.BlockSpec((TM, Hp), lambda i: (i, 0)),   # X rows (bf16)
                pl.BlockSpec((Hp, G3), lambda i: (0, 0)),   # W_ih fused (bf16)
                pl.BlockSpec((1, G3), lambda i: (0, 0)),    # folded bias (f32)
            ],
            out_specs=pl.BlockSpec((TM, G3), lambda i: (i, 0)),
        ),
        compiler_params=pltpu.CompilerParams(
            dimension_semantics=("parallel",),
            vmem_limit_bytes=VMEM_LIMIT_BYTES),
    )(x_flat, w_ih_f, b_proj)
    i_all = i_flat[:rows].reshape(T_pad, Bp, G3)             # bf16

    # ---- Pallas kernel 2: serial recurrence over (batch split, time blocks) ----
    h0 = jnp.pad(hidden[0].astype(jnp.float32), ((0, Bp - B), (0, Hp - H)))
    lens = jnp.pad(input_len.astype(jnp.int32), (0, Bp - B)).reshape(Bp, 1)

    kernel2 = functools.partial(gru_recurrence_kernel, unroll=min(unroll, TT))

    outputs_pad, h_final = pl.pallas_call(
        kernel2,
        out_shape=(jax.ShapeDtypeStruct((T_pad, Bp, Hp), jnp.float32),
                   jax.ShapeDtypeStruct((Bp, Hp), jnp.float32)),
        grid_spec=pltpu.PrefetchScalarGridSpec(
            num_scalar_prefetch=0,
            grid=(NB, NT),
            in_specs=[
                pl.BlockSpec((Bb, 1), lambda b, t: (b, 0)),           # lengths
                pl.BlockSpec((TT, Bb, G3), lambda b, t: (t, b, 0)),   # input projections (bf16)
                pl.BlockSpec((Bb, Hp), lambda b, t: (b, 0)),          # h0
                pl.BlockSpec((Hp, G3), lambda b, t: (0, 0)),          # W_hh fused (bf16)
                pl.BlockSpec((1, Hp), lambda b, t: (0, 0)),           # b_hh[n]
            ],
            out_specs=[
                pl.BlockSpec((TT, Bb, Hp), lambda b, t: (t, b, 0)),   # outputs block
                pl.BlockSpec((Bb, Hp), lambda b, t: (b, 0)),          # final hidden
            ],
            scratch_shapes=[pltpu.VMEM((Bb, Hp), jnp.float32)],
        ),
        compiler_params=pltpu.CompilerParams(
            dimension_semantics=("parallel", "arbitrary"),  # time is a true recurrence
            vmem_limit_bytes=VMEM_LIMIT_BYTES),
    )(lens, i_all, h0, w_hh_f, b_hn)

    outputs = outputs_pad[:T, :B, :H]
    hidden_out = h_final[:B, :H][None]
    return outputs, hidden_out                               # (T,B,H), (1,B,H)


# --------------------------------------------------------------------------
# Pure-JAX f32 reference mirroring the PyTorch packed-GRU semantics
# --------------------------------------------------------------------------
def reference_forward(tokens, hidden, input_len, params):
    emb, w_ih, w_hh, b_ih, b_hh = (params["emb"], params["w_ih"], params["w_hh"],
                                   params["b_ih"], params["b_hh"])
    T, B = tokens.shape
    x = emb[tokens]
    h = hidden[0]
    outs = []
    for t in range(T):
        x_t = x[t]
        r = jax.nn.sigmoid(x_t @ w_ih[0] + b_ih[0] + h @ w_hh[0] + b_hh[0])
        z = jax.nn.sigmoid(x_t @ w_ih[1] + b_ih[1] + h @ w_hh[1] + b_hh[1])
        n = jnp.tanh(x_t @ w_ih[2] + b_ih[2] + r * (h @ w_hh[2] + b_hh[2]))
        h_new = (1.0 - z) * n + z * h
        valid = (input_len > t)[:, None]
        h = jnp.where(valid, h_new, h)
        outs.append(jnp.where(valid, h_new, 0.0))
    return jnp.stack(outs), h[None]


if __name__ == "__main__":
    # Small shapes consistent with the module: vocab V, hidden H, batch B, seq T.
    V, H, B, T = 16, 32, 4, 8

    key = jax.random.PRNGKey(0)
    k_emb, k_wih, k_whh, k_bih, k_bhh, k_tok = jax.random.split(key, 6)

    params = {
        # nn.Embedding(V, H)
        "emb": jax.random.normal(k_emb, (V, H), jnp.float32) * 0.1,
        # nn.GRU(H, H): stored as (3, H, H) in "x @ W" orientation, gates [r, z, n].
        "w_ih": jax.random.normal(k_wih, (3, H, H), jnp.float32) * 0.1,
        "w_hh": jax.random.normal(k_whh, (3, H, H), jnp.float32) * 0.1,
        "b_ih": jax.random.normal(k_bih, (3, 1, H), jnp.float32) * 0.1,
        "b_hh": jax.random.normal(k_bhh, (3, 1, H), jnp.float32) * 0.1,
    }

    tokens = jax.random.randint(k_tok, (T, B), 0, V, jnp.int32)        # (T, B)
    hidden0 = jnp.zeros((1, B, H), jnp.float32)                        # initHidden
    input_len = jnp.array([T, 6, 5, 3], jnp.int32)                     # sorted desc (pack_padded_sequence)

    outputs, hidden = encoder_rnn_forward(tokens, hidden0, input_len, params)
    outputs = jax.block_until_ready(outputs)
    hidden = jax.block_until_ready(hidden)

    ref_out, ref_hid = reference_forward(tokens, hidden0, input_len, params)
    # bf16 MXU operands / bf16 intermediate I -> loosened tolerance vs f32 reference.
    np.testing.assert_allclose(np.asarray(outputs), np.asarray(ref_out), rtol=2e-2, atol=2e-2)
    np.testing.assert_allclose(np.asarray(hidden), np.asarray(ref_hid), rtol=2e-2, atol=2e-2)

    print("KERNEL_OK")
</pallas_src>

<mosaic_0001>
module attributes {stable_mosaic.version = 11 : i64} {
  func.func @input_proj_kernel(%arg0: i32, %arg1: memref<64x128xbf16, #tpu.memory_space<vmem>>, %arg2: memref<128x384xbf16, #tpu.memory_space<vmem>>, %arg3: memref<1x384xf32, #tpu.memory_space<vmem>>, %arg4: memref<64x384xbf16, #tpu.memory_space<vmem>>) attributes {dimension_semantics = [#tpu.dimension_semantics<parallel>], iteration_bounds = array<i64: 1>, scalar_prefetch = 0 : i64, scratch_operands = 0 : i64, tpu.core_type = #tpu.core_type<tc>, window_params = [{transform_indices = @transform_0, window_bounds = array<i64: 64, 128>}, {pipeline_mode = #tpu.pipeline_mode<synchronous>, transform_indices = @transform_1, window_bounds = array<i64: 128, 384>}, {pipeline_mode = #tpu.pipeline_mode<synchronous>, transform_indices = @transform_2, window_bounds = array<i64: 1, 384>}, {transform_indices = @transform_3, window_bounds = array<i64: 64, 384>}]} {
    %c0 = arith.constant 0 : index
    %c0_0 = arith.constant 0 : index
    %0 = vector.load %arg1[%c0, %c0_0] : memref<64x128xbf16, #tpu.memory_space<vmem>>, vector<64x128xbf16>
    %c0_1 = arith.constant 0 : index
    %c0_2 = arith.constant 0 : index
    %1 = vector.load %arg2[%c0_1, %c0_2] : memref<128x384xbf16, #tpu.memory_space<vmem>>, vector<128x384xbf16>
    %cst = arith.constant dense<0.000000e+00> : vector<64x384xf32>
    %2 = tpu.matmul %0, %1, %cst {dimension_numbers = #tpu.dot_dimension_numbers<[1], [0], [0], [1], [0, 0, 1, 1], [], []>} : vector<64x128xbf16>, vector<128x384xbf16>, vector<64x384xf32> -> vector<64x384xf32>
    %c0_3 = arith.constant 0 : index
    %c0_4 = arith.constant 0 : index
    %3 = vector.load %arg3[%c0_3, %c0_4] : memref<1x384xf32, #tpu.memory_space<vmem>>, vector<1x384xf32>
    %4 = vector.broadcast %3 : vector<1x384xf32> to vector<64x384xf32>
    %5 = arith.addf %2, %4 : vector<64x384xf32>
    %6 = arith.truncf %5 : vector<64x384xf32> to vector<64x384xbf16>
    %c0_5 = arith.constant 0 : index
    %c0_6 = arith.constant 0 : index
    %7 = vector.load %arg4[%c0_5, %c0_6] : memref<64x384xbf16, #tpu.memory_space<vmem>>, vector<64x384xbf16>
    tpu.vector_store %arg4[%c0_5, %c0_6], %6 {strides = array<i32>} : memref<64x384xbf16, #tpu.memory_space<vmem>>, vector<64x384xbf16>,
    return
  }
  func.func @transform_0(%arg0: i32) -> (i32, i32) {
    %c0_i32 = arith.constant 0 : i32
    %c0_i32_0 = arith.constant 0 : i32
    return %arg0, %c0_i32 : i32, i32
  }
  func.func @transform_1(%arg0: i32) -> (i32, i32) {
    %c0_i32 = arith.constant 0 : i32
    %c0_i32_0 = arith.constant 0 : i32
    %c0_i32_1 = arith.constant 0 : i32
    return %c0_i32, %c0_i32_0 : i32, i32
  }
  func.func @transform_2(%arg0: i32) -> (i32, i32) {
    %c0_i32 = arith.constant 0 : i32
    %c0_i32_0 = arith.constant 0 : i32
    %c0_i32_1 = arith.constant 0 : i32
    return %c0_i32, %c0_i32_0 : i32, i32
  }
  func.func @transform_3(%arg0: i32) -> (i32, i32) {
    %c0_i32 = arith.constant 0 : i32
    %c0_i32_0 = arith.constant 0 : i32
    return %arg0, %c0_i32 : i32, i32
  }
}

</mosaic_0001>

<bundles_post_ra>
// kernel: tpu_custom_call.1
= control target key start
LH: loop header
LB: loop body
LE: loop exit
PB: predicated region body
PF: predicated region fallthrough
CT: control target
= control target key end

     0   :  { %8 = vsyncpa [#allocation3], 0  ;;  %s733_s0 = inlined_call_operand.hbm [shape: bf16[64,128], index: 0, kind: input, shape index: {}]   ;;  %s734_s1 = inlined_call_operand.hbm [shape: bf16[128,384], index: 1, kind: input, shape index: {}]   ;;  %s735_s2 = inlined_call_operand.hbm [shape: f32[1,384], index: 2, kind: input, shape index: {}]   ;;  %s736_s3 = inlined_call_operand.hbm [shape: bf16[64,384], index: 3, kind: output, shape index: {}]  }
   0x1   :  { %9 = vsyncpa [#allocation6], 0  ;;  %s28_s14 = sshll.u32 %s734_s1, 4  ;;  %s29_s14 = int_to_ptr.hbm [resolvable:$true] %s28_s14 }
   0x2   :  { %10 = vsyncpa [#allocation4], 0  ;;  %s657_s15 = smov [#allocation5]   ;;  %s15_s19 = sshll.u32 %s733_s0, 4  ;;  %s16_s19 = int_to_ptr.hbm [resolvable:$true] %s15_s19 }
   0x3   :  { %s30_s16 = sshll.u32 %s657_s15, 4  ;;  %s658_s20 = smov 192   ;;  %s31_s16 = int_to_ptr.vmem [resolvable:$true] %s30_s16 }
   0x4   :  { %s659_s21 = smov 12   ;;  %s660_s22 = smov [#allocation2]  }
   0x5   :  { %36 = dma.hbm_to_vmem [thread:$0]  %s29_s14, 3072, %s31_s16, [#allocation6], %s658_s20, %s658_s20, %s659_s21  }
   0x6   :  { %s17_s23 = sshll.u32 %s660_s22, 4  ;;  %s661_s1 = smov 64   ;;  %s18_s23 = int_to_ptr.vmem [resolvable:$true] %s17_s23 }
   0x7   :  { %s662_s24 = smov 4   ;;  %s42_s27 = sshll.u32 %s735_s2, 4  ;;  %s43_s27 = int_to_ptr.hbm [resolvable:$true] %s42_s27 }
   0x8   :  { %23 = dma.hbm_to_vmem [thread:$0]  %s16_s19, 512, %s18_s23, [#allocation3], %s661_s1, %s661_s1, %s662_s24  }
   0x9   :  { %s663_s28 = smov [#allocation7]  }
   0xa   :  { %s44_s0 = sshll.u32 %s663_s28, 4  ;;  %s45_s0 = int_to_ptr.vmem [resolvable:$true] %s44_s0 }
   0xb   :  { %47 = dma.hbm_to_vmem [thread:$0]  %s43_s27, 48, %s45_s0, [#allocation6]  }
   0xc   :  { %651 = dma.done.wait [#allocation3], 512  }
   0xd   :  { %652 = vsyncadd [#allocation3], 4294966784 }
   0xe   :  { %653 = dma.done.wait [#allocation6], 3120  }
   0xf   :  { %654 = vsyncadd [#allocation6], 4294964176  ;;  %v501_v0 = vld [vmem:[#allocation5 + $0xa8] sm:$0xf]  ;;  %v537_v1 = vld [vmem:[#allocation5 + $0xb0] sm:$0xf0] }
  0x10   :  { %v536_v2 = vld [vmem:[#allocation5 + $0xac] sm:$0xf]  ;;  %v502_v3 = vor.u32 %v537_v1, %v501_v0  ;;  %v503_v4 = vld [vmem:[#allocation5 + $0xb4] sm:$0xf0]  ;;  %v509_v5 = vld [vmem:[#allocation5 + $0xb0] sm:$0xf] }
  0x11   :  { %v538_v6 = vld [vmem:[#allocation5 + $0xb8] sm:$0xf0]  ;;  %v506_v7 = vor.u32 %v536_v2, %v503_v4  ;;  %v489_v9 = vld [vmem:[#allocation5 + $0x90] sm:$0xf]  ;;  %v533_v11 = vld [vmem:[#allocation5 + $0x94] sm:$0xf] }
  0x12   :  { %v510_v8 = vor.u32 %v538_v6, %v509_v5  ;;  %v534_v10 = vld [vmem:[#allocation5 + $0x98] sm:$0xf0]  ;;  %260 = vmatpush.bf16.msra.mxu0 %v502_v3  ;;  %v491_v13 = vld [vmem:[#allocation5 + $0x9c] sm:$0xf0]  ;;  %v497_v14 = vld [vmem:[#allocation5 + $0x98] sm:$0xf]  ;;  %539 = vmatpush.bf16.msra.mxu3 %v502_v3 }
  0x13   :  { %v490_v12 = vor.u32 %v534_v10, %v489_v9  ;;  %v535_v15 = vld [vmem:[#allocation5 + $0xa0] sm:$0xf0]  ;;  %289 = vmatpush.bf16.msra.mxu1 %v506_v7  ;;  %v494_v16 = vor.u32 %v533_v11, %v491_v13  ;;  %v477_v18 = vld [vmem:[#allocation5 + $0x78] sm:$0xf]  ;;  %v530_v20 = vld [vmem:[#allocation5 + $0x7c] sm:$0xf] }
  0x14   :  { %318 = vmatpush.bf16.msra.mxu2 %v510_v8  ;;  %v498_v17 = vor.u32 %v535_v15, %v497_v14  ;;  %v531_v19 = vld [vmem:[#allocation5 + $0x80] sm:$0xf0]  ;;  %v479_v21 = vld [vmem:[#allocation5 + $0x84] sm:$0xf0]  ;;  %v485_v22 = vld [vmem:[#allocation5 + $0x80] sm:$0xf] }
  0x15   :  { %v532_v23 = vld [vmem:[#allocation5 + $0x88] sm:$0xf0]  ;;  %v478_v24 = vor.u32 %v531_v19, %v477_v18  ;;  %v482_v25 = vor.u32 %v530_v20, %v479_v21  ;;  %v465_v27 = vld [vmem:[#allocation5 + $0x60] sm:$0xf]  ;;  %v527_v29 = vld [vmem:[#allocation5 + $0x64] sm:$0xf] }
  0x16   :  { %261 = vmatpush.bf16.msra.mxu0 %v490_v12  ;;  %540 = vmatpush.bf16.msra.mxu3 %v490_v12  ;;  %v486_v26 = vor.u32 %v532_v23, %v485_v22  ;;  %v528_v28 = vld [vmem:[#allocation5 + $0x68] sm:$0xf0]  ;;  %v467_v30 = vld [vmem:[#allocation5 + $0x6c] sm:$0xf0]  ;;  %v473_v31 = vld [vmem:[#allocation5 + $0x68] sm:$0xf] }
  0x17   :  { %290 = vmatpush.bf16.msra.mxu1 %v494_v16  ;;  %v529_v32 = vld [vmem:[#allocation5 + $0x70] sm:$0xf0]  ;;  %v466_v33 = vor.u32 %v528_v28, %v465_v27  ;;  %v470_v34 = vor.u32 %v527_v29, %v467_v30  ;;  %v453_v36 = vld [vmem:[#allocation5 + $0x48] sm:$0xf]  ;;  %v524_v38 = vld [vmem:[#allocation5 + $0x4c] sm:$0xf] }
  0x18   :  { %319 = vmatpush.bf16.msra.mxu2 %v498_v17  ;;  %v474_v35 = vor.u32 %v529_v32, %v473_v31  ;;  %v525_v37 = vld [vmem:[#allocation5 + $0x50] sm:$0xf0]  ;;  %v455_v39 = vld [vmem:[#allocation5 + $0x54] sm:$0xf0]  ;;  %v461_v40 = vld [vmem:[#allocation5 + $0x50] sm:$0xf] }
  0x19   :  { %v526_v41 = vld [vmem:[#allocation5 + $0x58] sm:$0xf0]  ;;  %v454_v42 = vor.u32 %v525_v37, %v453_v36  ;;  %v458_v43 = vor.u32 %v524_v38, %v455_v39  ;;  %v441_v45 = vld [vmem:[#allocation5 + $0x30] sm:$0xf]  ;;  %v521_v47 = vld [vmem:[#allocation5 + $0x34] sm:$0xf] }
  0x1a   :  { %262 = vmatpush.bf16.msra.mxu0 %v478_v24  ;;  %541 = vmatpush.bf16.msra.mxu3 %v478_v24  ;;  %v462_v44 = vor.u32 %v526_v41, %v461_v40  ;;  %v522_v46 = vld [vmem:[#allocation5 + $0x38] sm:$0xf0]  ;;  %v443_v48 = vld [vmem:[#allocation5 + $0x3c] sm:$0xf0]  ;;  %v449_v49 = vld [vmem:[#allocation5 + $0x38] sm:$0xf] }
  0x1b   :  { %291 = vmatpush.bf16.msra.mxu1 %v482_v25  ;;  %v523_v50 = vld [vmem:[#allocation5 + $0x40] sm:$0xf0]  ;;  %v442_v51 = vor.u32 %v522_v46, %v441_v45  ;;  %v446_v52 = vor.u32 %v521_v47, %v443_v48  ;;  %v429_v54 = vld [vmem:[#allocation5 + $0x18] sm:$0xf]  ;;  %v518_v56 = vld [vmem:[#allocation5 + $0x1c] sm:$0xf] }
  0x1c   :  { %320 = vmatpush.bf16.msra.mxu2 %v486_v26  ;;  %v450_v53 = vor.u32 %v523_v50, %v449_v49  ;;  %v519_v55 = vld [vmem:[#allocation5 + $0x20] sm:$0xf0]  ;;  %v431_v57 = vld [vmem:[#allocation5 + $0x24] sm:$0xf0]  ;;  %v437_v58 = vld [vmem:[#allocation5 + $0x20] sm:$0xf] }
  0x1d   :  { %v520_v59 = vld [vmem:[#allocation5 + $0x28] sm:$0xf0]  ;;  %v430_v60 = vor.u32 %v519_v55, %v429_v54  ;;  %v434_v61 = vor.u32 %v518_v56, %v431_v57  ;;  %v417_v63 = vld [vmem:[#allocation5] sm:$0xf]  ;;  %v515_v1 = vld [vmem:[#allocation5 + $0x4] sm:$0xf] }
  0x1e   :  { %263 = vmatpush.bf16.msra.mxu0 %v466_v33  ;;  %542 = vmatpush.bf16.msra.mxu3 %v466_v33  ;;  %v438_v62 = vor.u32 %v520_v59, %v437_v58  ;;  %v516_v0 = vld [vmem:[#allocation5 + $0x8] sm:$0xf0]  ;;  %v419_v2 = vld [vmem:[#allocation5 + $0xc] sm:$0xf0]  ;;  %v425_v3 = vld [vmem:[#allocation5 + $0x8] sm:$0xf] }
  0x1f   :  { %292 = vmatpush.bf16.msra.mxu1 %v470_v34  ;;  %v517_v4 = vld [vmem:[#allocation5 + $0x10] sm:$0xf0]  ;;  %v418_v5 = vor.u32 %v516_v0, %v417_v63  ;;  %v422_v6 = vor.u32 %v515_v1, %v419_v2  ;;  %v511_v8 = vld [vmem:[#allocation2] sm:$0xff]  ;;  %v512_v9 = vld [vmem:[#allocation2 + $0x8] sm:$0xff]  ;;  %s664_s2 = smov [#allocation8]   ;;  %s385_s5 = sshll.u32 %s736_s3, 4  ;;  %s386_s5 = int_to_ptr.hbm [resolvable:$true] %s385_s5 }
  0x20   :  { %321 = vmatpush.bf16.msra.mxu2 %v474_v35  ;;  %v426_v7 = vor.u32 %v517_v4, %v425_v3  ;;  %v513_v10 = vld [vmem:[#allocation2 + $0x10] sm:$0xff]  ;;  %v514_v11 = vld [vmem:[#allocation2 + $0x18] sm:$0xff]  ;;  %v100_v12 = vld [vmem:[#allocation7] sm:$0x7]  ;;  %s383_s29 = sshll.u32 %s664_s2, 4  ;;  %s384_s29 = int_to_ptr.vmem [resolvable:$true] %s383_s29 }
  0x21   :  { %v697_v13 = vperm.slane %v100_v12, 0  ;;  %v699_v14 = vperm.slane %v100_v12, 1  ;;  %v703_v20 = vperm.slane %v100_v12, 2 }
  0x22   :  { %264 = vmatpush.bf16.msra.mxu0 %v454_v42  ;;  %543 = vmatpush.bf16.msra.mxu3 %v454_v42 }
  0x23   :  { %293 = vmatpush.bf16.msra.mxu1 %v458_v43 }
  0x24   :  { %322 = vmatpush.bf16.msra.mxu2 %v462_v44 }
  0x26   :  { %265 = vmatpush.bf16.msra.mxu0 %v442_v51  ;;  %544 = vmatpush.bf16.msra.mxu3 %v442_v51 }
  0x27   :  { %294 = vmatpush.bf16.msra.mxu1 %v446_v52 }
  0x28   :  { %323 = vmatpush.bf16.msra.mxu2 %v450_v53 }
  0x2a   :  { %266 = vmatpush.bf16.msra.mxu0 %v430_v60  ;;  %545 = vmatpush.bf16.msra.mxu3 %v430_v60 }
  0x2b   :  { %295 = vmatpush.bf16.msra.mxu1 %v434_v61 }
  0x2c   :  { %324 = vmatpush.bf16.msra.mxu2 %v438_v62 }
  0x2e   :  { %267 = vmatpush.bf16.msra.mxu0 %v418_v5  ;;  %546 = vmatpush.bf16.msra.mxu3 %v418_v5 }
  0x2f   :  { %296 = vmatpush.bf16.msra.mxu1 %v422_v6 }
  0x30   :  { %325 = vmatpush.bf16.msra.mxu2 %v426_v7 }
  0x31   :  { %268 = vmatmul.bf16.vlgmr.msra.gmra.mxu0 %v511_v8  ;;  %273 = vmatmul.bf16.vlgmr.msra.gmra.mxu3 %v512_v9 }
  0x32   :  { %297 = vmatmul.bf16.vlgmr.msra.gmra.mxu1 %v511_v8 }
  0x33   :  { %326 = vmatmul.bf16.vlgmr.msra.gmra.mxu2 %v511_v8 }
  0x41   :  { %278 = vmatmul.bf16.gmra.mxu3 %v513_v10 }
  0x42   :  { %302 = vmatmul.bf16.gmra.mxu1 %v512_v9 }
  0x43   :  { %331 = vmatmul.bf16.gmra.mxu2 %v512_v9 }
  0x51   :  { %283 = vmatmul.bf16.gmra.mxu3 %v514_v11 }
  0x52   :  { %307 = vmatmul.bf16.gmra.mxu1 %v513_v10 }
  0x53   :  { %336 = vmatmul.bf16.gmra.mxu2 %v513_v10 }
  0x62   :  { %312 = vmatmul.bf16.gmra.mxu1 %v514_v11 }
  0x63   :  { %341 = vmatmul.bf16.gmra.mxu2 %v514_v11 }
  0xae   :  { %v269_v15 = vpop.f32.mrf.mxu0 }
  0xaf   :  { %v270_v16 = vadd.f32 %v269_v15, %v697_v13  ;;  %v298_v17 = vpop.f32.mrf.mxu1 }
  0xb0   :  { %v299_v18 = vadd.f32 %v298_v17, %v699_v14 }
  0xb2   :  { %v347_v19 = vpack.c.bf16 %v299_v18, %v270_v16 }
  0xb4   :  { %363 = vst [vmem:[#allocation8] sm:$0xff] %v347_v19  ;;  %v274_v21 = vpop.f32.mrf.mxu3 }
  0xb5   :  { %v275_v32 = vadd.f32 %v274_v21, %v697_v13 }
  0xb6   :  { %v327_v22 = vpop.f32.mrf.mxu2  ;;  %v271_v24 = vpop.f32.mrf.mxu0 }
  0xb7   :  { %v328_v23 = vadd.f32 %v327_v22, %v703_v20  ;;  %v272_v25 = vadd.f32 %v271_v24, %v697_v13  ;;  %v300_v26 = vpop.f32.mrf.mxu1 }
  0xb8   :  { %v301_v28 = vadd.f32 %v300_v26, %v699_v14 }
  0xb9   :  { %v348_v27 = vpack.c.bf16 %v328_v23, %v328_v23 }
  0xba   :  { %v349_v29 = vpack.c.bf16 %v301_v28, %v272_v25 }
  0xbb   :  { %364 = vst [vmem:[#allocation8 + $0x8] sm:$0xf] %v348_v27 }
  0xbc   :  { %365 = vst [vmem:[#allocation8 + $0xc] sm:$0xff] %v349_v29  ;;  %v276_v31 = vpop.f32.mrf.mxu3 }
  0xbd   :  { %v277_v42 = vadd.f32 %v276_v31, %v697_v13 }
  0xbe   :  { %v329_v30 = vpop.f32.mrf.mxu2 }
  0xbf   :  { %v330_v33 = vadd.f32 %v329_v30, %v703_v20  ;;  %v303_v34 = vpop.f32.mrf.mxu1 }
  0xc0   :  { %v304_v36 = vadd.f32 %v303_v34, %v699_v14 }
  0xc1   :  { %v350_v35 = vpack.c.bf16 %v330_v33, %v330_v33 }
  0xc2   :  { %v351_v37 = vpack.c.bf16 %v304_v36, %v275_v32 }
  0xc3   :  { %366 = vst [vmem:[#allocation8 + $0x14] sm:$0xf] %v350_v35 }
  0xc4   :  { %367 = vst [vmem:[#allocation8 + $0x18] sm:$0xff] %v351_v37  ;;  %v279_v41 = vpop.f32.mrf.mxu3 }
  0xc5   :  { %v280_v47 = vadd.f32 %v279_v41, %v697_v13 }
  0xc6   :  { %v332_v38 = vpop.f32.mrf.mxu2 }
  0xc7   :  { %v333_v39 = vadd.f32 %v332_v38, %v703_v20  ;;  %v305_v40 = vpop.f32.mrf.mxu1 }
  0xc8   :  { %v306_v44 = vadd.f32 %v305_v40, %v699_v14 }
  0xc9   :  { %v352_v43 = vpack.c.bf16 %v333_v39, %v333_v39 }
  0xca   :  { %v353_v45 = vpack.c.bf16 %v306_v44, %v277_v42 }
  0xcb   :  { %368 = vst [vmem:[#allocation8 + $0x20] sm:$0xf] %v352_v43 }
  0xcc   :  { %369 = vst [vmem:[#allocation8 + $0x24] sm:$0xff] %v353_v45  ;;  %v281_v52 = vpop.f32.mrf.mxu3 }
  0xcd   :  { %v282_v57 = vadd.f32 %v281_v52, %v697_v13 }
  0xce   :  { %v334_v46 = vpop.f32.mrf.mxu2 }
  0xcf   :  { %v335_v48 = vadd.f32 %v334_v46, %v703_v20  ;;  %v308_v49 = vpop.f32.mrf.mxu1 }
  0xd0   :  { %v309_v51 = vadd.f32 %v308_v49, %v699_v14 }
  0xd1   :  { %v354_v50 = vpack.c.bf16 %v335_v48, %v335_v48 }
  0xd2   :  { %v355_v53 = vpack.c.bf16 %v309_v51, %v280_v47 }
  0xd3   :  { %370 = vst [vmem:[#allocation8 + $0x2c] sm:$0xf] %v354_v50 }
  0xd4   :  { %371 = vst [vmem:[#allocation8 + $0x30] sm:$0xff] %v355_v53  ;;  %v284_v61 = vpop.f32.mrf.mxu3 }
  0xd5   :  { %v285_v63 = vadd.f32 %v284_v61, %v697_v13 }
  0xd6   :  { %v337_v54 = vpop.f32.mrf.mxu2 }
  0xd7   :  { %v338_v55 = vadd.f32 %v337_v54, %v703_v20  ;;  %v310_v56 = vpop.f32.mrf.mxu1 }
  0xd8   :  { %v311_v59 = vadd.f32 %v310_v56, %v699_v14 }
  0xd9   :  { %v356_v58 = vpack.c.bf16 %v338_v55, %v338_v55 }
  0xda   :  { %v357_v60 = vpack.c.bf16 %v311_v59, %v282_v57 }
  0xdb   :  { %372 = vst [vmem:[#allocation8 + $0x38] sm:$0xf] %v356_v58 }
  0xdc   :  { %373 = vst [vmem:[#allocation8 + $0x3c] sm:$0xff] %v357_v60  ;;  %v286_v5 = vpop.f32.mrf.mxu3 }
  0xdd   :  { %v287_v9 = vadd.f32 %v286_v5, %v697_v13 }
  0xde   :  { %v339_v62 = vpop.f32.mrf.mxu2 }
  0xdf   :  { %v340_v0 = vadd.f32 %v339_v62, %v703_v20  ;;  %v313_v1 = vpop.f32.mrf.mxu1 }
  0xe0   :  { %v314_v3 = vadd.f32 %v313_v1, %v699_v14 }
  0xe1   :  { %v358_v2 = vpack.c.bf16 %v340_v0, %v340_v0 }
  0xe2   :  { %v359_v4 = vpack.c.bf16 %v314_v3, %v285_v63 }
  0xe3   :  { %374 = vst [vmem:[#allocation8 + $0x44] sm:$0xf] %v358_v2 }
  0xe4   :  { %375 = vst [vmem:[#allocation8 + $0x48] sm:$0xff] %v359_v4 }
  0xe6   :  { %v342_v6 = vpop.f32.mrf.mxu2 }
  0xe7   :  { %v343_v7 = vadd.f32 %v342_v6, %v703_v20  ;;  %v315_v8 = vpop.f32.mrf.mxu1 }
  0xe8   :  { %v316_v11 = vadd.f32 %v315_v8, %v699_v14 }
  0xe9   :  { %v360_v10 = vpack.c.bf16 %v343_v7, %v343_v7 }
  0xea   :  { %v361_v12 = vpack.c.bf16 %v316_v11, %v287_v9 }
  0xeb   :  { %376 = vst [vmem:[#allocation8 + $0x50] sm:$0xf] %v360_v10 }
  0xec   :  { %377 = vst [vmem:[#allocation8 + $0x54] sm:$0xff] %v361_v12 }
  0xee   :  { %v344_v15 = vpop.f32.mrf.mxu2 }
  0xef   :  { %v345_v16 = vadd.f32 %v344_v15, %v703_v20 }
  0xf1   :  { %v362_v17 = vpack.c.bf16 %v345_v16, %v345_v16 }
  0xf3   :  { %378 = vst [vmem:[#allocation8 + $0x5c] sm:$0xf] %v362_v17 }
  0xf4   :  { %391 = dma.vmem_to_hbm [thread:$0]  %s384_s29, 1536, %s386_s5, [#allocation4], %s658_s20, %s658_s20, %s659_s21  }
  0xf5   :  { %655 = dma.done.wait [#allocation4], 1536  }
  0xf6   :  { %656 = vsyncadd [#allocation4], 4294965760 }
  0xf7   :  { %396 = vsyncpa [#allocation3], 1 }
  0xf8   :  { %397 = vsyncpa [#allocation6], 1 }
  0xf9   :  { %398 = vsyncpa [#allocation4], 1 }

</bundles_post_ra>
